<compile_context>
chip_gen: v7x
topology: tpu7x:2x2x1
jax: 0.10.0
libtpu: 0.0.40
codegen_flags: <defaults>
</compile_context>

<pallas_src>
import functools

import jax
import jax.numpy as jnp
from jax.experimental import pallas as pl
from jax.experimental.pallas import tpu as pltpu

_SQRT_HALF = 0.7071067811865476  # 1/sqrt(2) for exact (erf) GELU


def _mlp_kernel(x_ref, w1_ref, b1_ref, w2_ref, b2_ref, o_ref, *, approximate):
    """One row tile: (tm, in) @ (in, hid) -> GELU -> (tm, hid) @ (hid, out)."""
    x = x_ref[...]
    # fc1: MXU matmul with f32 accumulation, bias added in f32.
    h = jnp.dot(x, w1_ref[...], preferred_element_type=jnp.float32)
    h = h + b1_ref[...].astype(jnp.float32)
    if approximate:
        # tanh GELU: transcendental goes to the EUP slot (free when VALU-bound).
        # NOTE: semantics differ slightly from torch.nn.GELU() default.
        h = jax.nn.gelu(h, approximate=True)
    else:
        # exact (erf) GELU in f32, matching torch.nn.GELU() default.
        h = 0.5 * h * (1.0 + jax.lax.erf(h * jnp.float32(_SQRT_HALF)))
    # fc2: cast activation back to the streaming dtype (bf16 on v6e/v7x).
    o = jnp.dot(h.astype(x.dtype), w2_ref[...], preferred_element_type=jnp.float32)
    o = o + b2_ref[...].astype(jnp.float32)
    o_ref[...] = o.astype(o_ref.dtype)
    # The ragged final row tile also runs this on padded rows; that is safe
    # only because every op here is strictly row-wise (no cross-row reduction).


def _round_up(a, b):
    return ((a + b - 1) // b) * b


def _pad_last(a, target):
    pad = target - a.shape[-1]
    if pad == 0:
        return a
    return jnp.pad(a, [(0, 0)] * (a.ndim - 1) + [(0, pad)])


def _pad_rows(a, target):
    pad = target - a.shape[0]
    if pad == 0:
        return a
    return jnp.pad(a, [(0, pad)] + [(0, 0)] * (a.ndim - 1))


def _const_spec(shape, single_buffer):
    """BlockSpec for an operand that is fully VMEM-resident across the grid."""
    index_map = lambda i: (0, 0)
    if single_buffer:
        try:
            # Constant index map => never re-fetched, so one buffer suffices;
            # halves weight VMEM at zero perf cost (important on v7x 64 MiB).
            return pl.BlockSpec(shape, index_map, pipeline_mode=pl.Buffered(1))
        except (TypeError, AttributeError):
            pass  # older jax without pipeline_mode / Buffered
    return pl.BlockSpec(shape, index_map)


def mlp_pallas(x, w1, b1, w2, b2, *, tm=512, lane_pad=True, approximate=False):
    """Applies the MLP to the last dim of x.

    Args:
      x:  (..., in_dim)           (bf16 recommended on v6e/v7x)
      w1: (in_dim, hidden_dim)    (transposed from PyTorch's (hid, in) layout)
      b1: (hidden_dim,)
      w2: (hidden_dim, out_dim)
      b2: (out_dim,)
      tm: row tile size (multiple of 8; 512-1024 recommended, sweep per chip).
      lane_pad: zero-pad hidden/out feature dims to multiples of 128 so stores
        are lane-dense (unmasked vst); padded output columns are sliced off.
      approximate: use tanh GELU (EUP slot) instead of exact erf.
    Returns:
      (..., out_dim)
    """
    in_dim = x.shape[-1]
    hidden_dim = w1.shape[1]
    out_dim = w2.shape[1]
    assert w1.shape[0] == in_dim and w2.shape[0] == hidden_dim
    assert b1.shape == (hidden_dim,) and b2.shape == (out_dim,)

    lead_shape = x.shape[:-1]
    x2d = x.reshape(-1, in_dim)
    m = x2d.shape[0]

    # --- lane-dense feature layout (weights only; x is never padded) --------
    if lane_pad:
        hid_p = _round_up(hidden_dim, 128)
        out_p = _round_up(out_dim, 128)
    else:
        hid_p, out_p = hidden_dim, out_dim
    # Zero-padded columns/rows are inert: padded hidden cols get bias 0 ->
    # GELU(0)=0 -> hit zero rows of w2; padded out cols stay 0 and are sliced.
    w1p = _pad_last(w1, hid_p)
    b1p = _pad_last(b1, hid_p).reshape(1, hid_p)
    w2p = _pad_last(_pad_rows(w2, hid_p), out_p)
    b2p = _pad_last(b2, out_p).reshape(1, out_p)

    # --- row tiling ----------------------------------------------------------
    tm_req = max(8, _round_up(int(tm), 8))
    if m <= tm_req:
        tm_eff = m  # single full-extent block (always legal)
    else:
        # Even number (>=2) of balanced row chunks so ("parallel",) shards the
        # grid across both v7x TensorCores; neutral on single-TC v5e/v6e.
        n_chunks = 2 * pl.cdiv(m, 2 * tm_req)
        tm_eff = min(tm_req, _round_up(pl.cdiv(m, n_chunks), 8))
    grid = (pl.cdiv(m, tm_eff),)

    act_bytes = jnp.dtype(x.dtype).itemsize
    w_bytes = jnp.dtype(w1.dtype).itemsize

    cost = pl.CostEstimate(
        flops=2 * m * (in_dim * hid_p + hid_p * out_p),
        transcendentals=m * hid_p,  # one erf/tanh per hidden activation
        bytes_accessed=m * (in_dim + out_p) * act_bytes
        + (in_dim * hid_p + hid_p * out_p + hid_p + out_p) * w_bytes,
    )

    # Explicit VMEM budget: v5e scoped default is only 16 MiB; cap at v7x's
    # 64 MiB physical.  2x margin over the estimated footprint.
    vmem_est = (
        2 * tm_eff * in_dim * act_bytes            # x stream, double-buffered
        + 2 * tm_eff * out_p * act_bytes           # out stream, double-buffered
        + 2 * tm_eff * hid_p * 4                   # f32 intermediates
        + 2 * (in_dim * hid_p + hid_p * out_p + hid_p + out_p) * w_bytes
    )
    vmem_limit = int(min(64 * 1024 * 1024, max(2 * vmem_est, 32 * 1024 * 1024)))

    kernel = functools.partial(_mlp_kernel, approximate=approximate)

    def build(single_buffer_weights):
        return pl.pallas_call(
            kernel,
            out_shape=jax.ShapeDtypeStruct((m, out_p), x.dtype),
            grid_spec=pltpu.PrefetchScalarGridSpec(
                num_scalar_prefetch=0,
                grid=grid,
                in_specs=[
                    # x row tile.  TODO(synk): pipeline_mode=pl.Buffered(3) here
                    # if a trace shows exposed x DMA at tm>=512.
                    pl.BlockSpec((tm_eff, in_dim), lambda i: (i, 0)),
                    _const_spec((in_dim, hid_p), single_buffer_weights),  # w1
                    _const_spec((1, hid_p), single_buffer_weights),       # b1
                    _const_spec((hid_p, out_p), single_buffer_weights),   # w2
                    _const_spec((1, out_p), single_buffer_weights),       # b2
                ],
                out_specs=pl.BlockSpec((tm_eff, out_p), lambda i: (i, 0)),
            ),
            compiler_params=pltpu.CompilerParams(
                dimension_semantics=("parallel",),  # shards across TCs on v7x
                vmem_limit_bytes=vmem_limit,
            ),
            cost_estimate=cost,
        )

    # TODO(synk): for models where single-buffered weights no longer fit VMEM,
    # add a hidden-dim grid axis (tile fc1's N / fc2's K with an f32 VMEM
    # accumulator) instead of keeping both weight matrices fully resident.
    try:
        out2d = build(True)(x2d, w1p, b1p, w2p, b2p)
    except Exception:
        # Fallback for jax/Mosaic builds that reject single-buffered operands
        # (only effective when called eagerly; under an outer jit the default
        # double-buffered path can be selected by the caller directly).
        out2d = build(False)(x2d, w1p, b1p, w2p, b2p)

    if out_p != out_dim:
        out2d = out2d[:, :out_dim]
    return out2d.reshape(*lead_shape, out_dim)


def init_mlp_params(key, in_dim, hidden_dim=None, out_dim=None, dtype=jnp.float32):
    """Deterministic synthetic parameters (shapes match the nn.Linear layers)."""
    out_dim = out_dim or in_dim
    hidden_dim = hidden_dim or in_dim
    k1, k2, k3, k4 = jax.random.split(key, 4)
    # Stored in (in, out) orientation so the kernel can do x @ w directly.
    bound1 = 1.0 / jnp.sqrt(in_dim)
    bound2 = 1.0 / jnp.sqrt(hidden_dim)
    w1 = jax.random.uniform(k1, (in_dim, hidden_dim), dtype, -bound1, bound1)
    b1 = jax.random.uniform(k2, (hidden_dim,), dtype, -bound1, bound1)
    w2 = jax.random.uniform(k3, (hidden_dim, out_dim), dtype, -bound2, bound2)
    b2 = jax.random.uniform(k4, (out_dim,), dtype, -bound2, bound2)
    return w1, b1, w2, b2


def mlp_reference(x, w1, b1, w2, b2, approximate=False):
    """Pure-JAX reference for correctness checking."""
    shp = x.shape
    x2d = x.reshape(-1, shp[-1])
    h = x2d @ w1 + b1
    if approximate:
        h = jax.nn.gelu(h, approximate=True)
    else:
        h = 0.5 * h * (1.0 + jax.lax.erf(h * jnp.float32(_SQRT_HALF)))
    o = h @ w2 + b2
    return o.reshape(*shp[:-1], w2.shape[1])


if __name__ == "__main__":
    key = jax.random.PRNGKey(0)
    kx1, kx2, kp = jax.random.split(key, 3)

    # Small shapes consistent with the module's forward (channels-last MLP).
    batch, seq, in_dim, hidden_dim, out_dim = 2, 8, 32, 64, 32
    w1, b1, w2, b2 = init_mlp_params(kp, in_dim, hidden_dim, out_dim)

    # Case 1: f32, whole problem in a single tile, lane-dense padded output.
    x1 = jax.random.normal(kx1, (batch, seq, in_dim), dtype=jnp.float32)
    y1 = jax.block_until_ready(mlp_pallas(x1, w1, b1, w2, b2))
    y1_ref = mlp_reference(x1, w1, b1, w2, b2)
    assert y1.shape == (batch, seq, out_dim), y1.shape
    assert jnp.allclose(y1, y1_ref, atol=1e-5, rtol=1e-5), float(
        jnp.max(jnp.abs(y1 - y1_ref))
    )

    # Case 2: f32, multi-step grid with ragged final tile, native (masked-store)
    # feature layout (lane_pad=False) to exercise the un-padded path.
    x2 = jax.random.normal(kx2, (4, 200, in_dim), dtype=jnp.float32)  # m = 800
    y2 = jax.block_until_ready(mlp_pallas(x2, w1, b1, w2, b2, tm=128, lane_pad=False))
    y2_ref = mlp_reference(x2, w1, b1, w2, b2)
    assert y2.shape == (4, 200, out_dim), y2.shape
    assert jnp.allclose(y2, y2_ref, atol=1e-5, rtol=1e-5), float(
        jnp.max(jnp.abs(y2 - y2_ref))
    )

    # Case 3: bf16 streaming (v6e/v7x path), multi-tile with an even grid for
    # v7x megacore; f32 accumulation inside the kernel, relaxed tolerance.
    xb = x2.astype(jnp.bfloat16)
    w1b, b1b, w2b, b2b = (a.astype(jnp.bfloat16) for a in (w1, b1, w2, b2))
    y3 = jax.block_until_ready(mlp_pallas(xb, w1b, b1b, w2b, b2b, tm=512))
    y3_ref = mlp_reference(
        xb.astype(jnp.float32), w1b.astype(jnp.float32), b1b.astype(jnp.float32),
        w2b.astype(jnp.float32), b2b.astype(jnp.float32))
    assert y3.shape == (4, 200, out_dim), y3.shape
    assert jnp.allclose(y3.astype(jnp.float32), y3_ref, atol=3e-2, rtol=3e-2), float(
        jnp.max(jnp.abs(y3.astype(jnp.float32) - y3_ref))
    )

    # Case 4: tanh-approx GELU (EUP path) — semantics change vs torch default.
    y4 = jax.block_until_ready(mlp_pallas(x1, w1, b1, w2, b2, approximate=True))
    y4_ref = mlp_reference(x1, w1, b1, w2, b2, approximate=True)
    assert jnp.allclose(y4, y4_ref, atol=1e-5, rtol=1e-5), float(
        jnp.max(jnp.abs(y4 - y4_ref))
    )

    print("KERNEL_OK")
</pallas_src>

<mosaic_0001>
module attributes {stable_mosaic.version = 11 : i64} {
  func.func @_mlp_kernel(%arg0: i32, %arg1: memref<16x32xf32, #tpu.memory_space<vmem>>, %arg2: memref<32x128xf32, #tpu.memory_space<vmem>>, %arg3: memref<1x128xf32, #tpu.memory_space<vmem>>, %arg4: memref<128x128xf32, #tpu.memory_space<vmem>>, %arg5: memref<1x128xf32, #tpu.memory_space<vmem>>, %arg6: memref<16x128xf32, #tpu.memory_space<vmem>>) attributes {dimension_semantics = [#tpu.dimension_semantics<parallel>], iteration_bounds = array<i64: 1>, scalar_prefetch = 0 : i64, scratch_operands = 0 : i64, tpu.core_type = #tpu.core_type<tc>, window_params = [{transform_indices = @transform_0, window_bounds = array<i64: 16, 32>}, {pipeline_mode = #tpu.pipeline_mode<synchronous>, transform_indices = @transform_1, window_bounds = array<i64: 32, 128>}, {pipeline_mode = #tpu.pipeline_mode<synchronous>, transform_indices = @transform_2, window_bounds = array<i64: 1, 128>}, {pipeline_mode = #tpu.pipeline_mode<synchronous>, transform_indices = @transform_3, window_bounds = array<i64: 128, 128>}, {pipeline_mode = #tpu.pipeline_mode<synchronous>, transform_indices = @transform_4, window_bounds = array<i64: 1, 128>}, {transform_indices = @transform_5, window_bounds = array<i64: 16, 128>}]} {
    %c0 = arith.constant 0 : index
    %c0_0 = arith.constant 0 : index
    %0 = vector.load %arg1[%c0, %c0_0] : memref<16x32xf32, #tpu.memory_space<vmem>>, vector<16x32xf32>
    %c0_1 = arith.constant 0 : index
    %c0_2 = arith.constant 0 : index
    %1 = vector.load %arg2[%c0_1, %c0_2] : memref<32x128xf32, #tpu.memory_space<vmem>>, vector<32x128xf32>
    %cst = arith.constant dense<0.000000e+00> : vector<16x128xf32>
    %2 = tpu.matmul %0, %1, %cst {dimension_numbers = #tpu.dot_dimension_numbers<[1], [0], [0], [1], [0, 0, 1, 1], [], []>} : vector<16x32xf32>, vector<32x128xf32>, vector<16x128xf32> -> vector<16x128xf32>
    %c0_3 = arith.constant 0 : index
    %c0_4 = arith.constant 0 : index
    %3 = vector.load %arg3[%c0_3, %c0_4] : memref<1x128xf32, #tpu.memory_space<vmem>>, vector<1x128xf32>
    %4 = vector.broadcast %3 : vector<1x128xf32> to vector<16x128xf32>
    %5 = arith.addf %2, %4 : vector<16x128xf32>
    %cst_5 = arith.constant 5.000000e-01 : f32
    %6 = vector.broadcast %cst_5 : f32 to vector<16x128xf32>
    %7 = arith.mulf %6, %5 : vector<16x128xf32>
    %cst_6 = arith.constant 0.707106769 : f32
    %8 = vector.broadcast %cst_6 : f32 to vector<16x128xf32>
    %9 = arith.mulf %5, %8 : vector<16x128xf32>
    %10 = math.erf %9 : vector<16x128xf32>
    %cst_7 = arith.constant 1.000000e+00 : f32
    %11 = vector.broadcast %cst_7 : f32 to vector<16x128xf32>
    %12 = arith.addf %11, %10 : vector<16x128xf32>
    %13 = arith.mulf %7, %12 : vector<16x128xf32>
    %c0_8 = arith.constant 0 : index
    %c0_9 = arith.constant 0 : index
    %14 = vector.load %arg4[%c0_8, %c0_9] : memref<128x128xf32, #tpu.memory_space<vmem>>, vector<128x128xf32>
    %cst_10 = arith.constant dense<0.000000e+00> : vector<16x128xf32>
    %15 = tpu.matmul %13, %14, %cst_10 {dimension_numbers = #tpu.dot_dimension_numbers<[1], [0], [0], [1], [0, 0, 1, 1], [], []>} : vector<16x128xf32>, vector<128x128xf32>, vector<16x128xf32> -> vector<16x128xf32>
    %c0_11 = arith.constant 0 : index
    %c0_12 = arith.constant 0 : index
    %16 = vector.load %arg5[%c0_11, %c0_12] : memref<1x128xf32, #tpu.memory_space<vmem>>, vector<1x128xf32>
    %17 = vector.broadcast %16 : vector<1x128xf32> to vector<16x128xf32>
    %18 = arith.addf %15, %17 : vector<16x128xf32>
    %c0_13 = arith.constant 0 : index
    %c0_14 = arith.constant 0 : index
    %19 = vector.load %arg6[%c0_13, %c0_14] : memref<16x128xf32, #tpu.memory_space<vmem>>, vector<16x128xf32>
    tpu.vector_store %arg6[%c0_13, %c0_14], %18 {strides = array<i32>} : memref<16x128xf32, #tpu.memory_space<vmem>>, vector<16x128xf32>,
    return
  }
  func.func @transform_0(%arg0: i32) -> (i32, i32) {
    %c0_i32 = arith.constant 0 : i32
    %c0_i32_0 = arith.constant 0 : i32
    return %arg0, %c0_i32 : i32, i32
  }
  func.func @transform_1(%arg0: i32) -> (i32, i32) {
    %c0_i32 = arith.constant 0 : i32
    %c0_i32_0 = arith.constant 0 : i32
    %c0_i32_1 = arith.constant 0 : i32
    return %c0_i32, %c0_i32_0 : i32, i32
  }
  func.func @transform_2(%arg0: i32) -> (i32, i32) {
    %c0_i32 = arith.constant 0 : i32
    %c0_i32_0 = arith.constant 0 : i32
    %c0_i32_1 = arith.constant 0 : i32
    return %c0_i32, %c0_i32_0 : i32, i32
  }
  func.func @transform_3(%arg0: i32) -> (i32, i32) {
    %c0_i32 = arith.constant 0 : i32
    %c0_i32_0 = arith.constant 0 : i32
    %c0_i32_1 = arith.constant 0 : i32
    return %c0_i32, %c0_i32_0 : i32, i32
  }
  func.func @transform_4(%arg0: i32) -> (i32, i32) {
    %c0_i32 = arith.constant 0 : i32
    %c0_i32_0 = arith.constant 0 : i32
    %c0_i32_1 = arith.constant 0 : i32
    return %c0_i32, %c0_i32_0 : i32, i32
  }
  func.func @transform_5(%arg0: i32) -> (i32, i32) {
    %c0_i32 = arith.constant 0 : i32
    %c0_i32_0 = arith.constant 0 : i32
    return %arg0, %c0_i32 : i32, i32
  }
}

module attributes {stable_mosaic.version = 11 : i64} {
  func.func @_mlp_kernel(%arg0: i32, %arg1: memref<16x32xf32, #tpu.memory_space<vmem>>, %arg2: memref<32x128xf32, #tpu.memory_space<vmem>>, %arg3: memref<1x128xf32, #tpu.memory_space<vmem>>, %arg4: memref<128x128xf32, #tpu.memory_space<vmem>>, %arg5: memref<1x128xf32, #tpu.memory_space<vmem>>, %arg6: memref<16x128xf32, #tpu.memory_space<vmem>>) attributes {dimension_semantics = [#tpu.dimension_semantics<parallel>], iteration_bounds = array<i64: 1>, scalar_prefetch = 0 : i64, scratch_operands = 0 : i64, tpu.core_type = #tpu.core_type<tc>, window_params = [{transform_indices = @transform_0, window_bounds = array<i64: 16, 32>}, {pipeline_mode = #tpu.pipeline_mode<synchronous>, transform_indices = @transform_1, window_bounds = array<i64: 32, 128>}, {pipeline_mode = #tpu.pipeline_mode<synchronous>, transform_indices = @transform_2, window_bounds = array<i64: 1, 128>}, {pipeline_mode = #tpu.pipeline_mode<synchronous>, transform_indices = @transform_3, window_bounds = array<i64: 128, 128>}, {pipeline_mode = #tpu.pipeline_mode<synchronous>, transform_indices = @transform_4, window_bounds = array<i64: 1, 128>}, {transform_indices = @transform_5, window_bounds = array<i64: 16, 128>}]} {
    %c0 = arith.constant 0 : index
    %c0_0 = arith.constant 0 : index
    %0 = vector.load %arg1[%c0, %c0_0] : memref<16x32xf32, #tpu.memory_space<vmem>>, vector<16x32xf32>
    %c0_1 = arith.constant 0 : index
    %c0_2 = arith.constant 0 : index
    %1 = vector.load %arg2[%c0_1, %c0_2] : memref<32x128xf32, #tpu.memory_space<vmem>>, vector<32x128xf32>
    %cst = arith.constant dense<0.000000e+00> : vector<16x128xf32>
    %2 = tpu.matmul %0, %1, %cst {dimension_numbers = #tpu.dot_dimension_numbers<[1], [0], [0], [1], [0, 0, 1, 1], [], []>} : vector<16x32xf32>, vector<32x128xf32>, vector<16x128xf32> -> vector<16x128xf32>
    %c0_3 = arith.constant 0 : index
    %c0_4 = arith.constant 0 : index
    %3 = vector.load %arg3[%c0_3, %c0_4] : memref<1x128xf32, #tpu.memory_space<vmem>>, vector<1x128xf32>
    %4 = vector.broadcast %3 : vector<1x128xf32> to vector<16x128xf32>
    %5 = arith.addf %2, %4 : vector<16x128xf32>
    %cst_5 = arith.constant 5.000000e-01 : f32
    %6 = vector.broadcast %cst_5 : f32 to vector<16x128xf32>
    %7 = arith.mulf %6, %5 : vector<16x128xf32>
    %cst_6 = arith.constant 0.707106769 : f32
    %8 = vector.broadcast %cst_6 : f32 to vector<16x128xf32>
    %9 = arith.mulf %5, %8 : vector<16x128xf32>
    %10 = math.erf %9 : vector<16x128xf32>
    %cst_7 = arith.constant 1.000000e+00 : f32
    %11 = vector.broadcast %cst_7 : f32 to vector<16x128xf32>
    %12 = arith.addf %11, %10 : vector<16x128xf32>
    %13 = arith.mulf %7, %12 : vector<16x128xf32>
    %c0_8 = arith.constant 0 : index
    %c0_9 = arith.constant 0 : index
    %14 = vector.load %arg4[%c0_8, %c0_9] : memref<128x128xf32, #tpu.memory_space<vmem>>, vector<128x128xf32>
    %cst_10 = arith.constant dense<0.000000e+00> : vector<16x128xf32>
    %15 = tpu.matmul %13, %14, %cst_10 {dimension_numbers = #tpu.dot_dimension_numbers<[1], [0], [0], [1], [0, 0, 1, 1], [], []>} : vector<16x128xf32>, vector<128x128xf32>, vector<16x128xf32> -> vector<16x128xf32>
    %c0_11 = arith.constant 0 : index
    %c0_12 = arith.constant 0 : index
    %16 = vector.load %arg5[%c0_11, %c0_12] : memref<1x128xf32, #tpu.memory_space<vmem>>, vector<1x128xf32>
    %17 = vector.broadcast %16 : vector<1x128xf32> to vector<16x128xf32>
    %18 = arith.addf %15, %17 : vector<16x128xf32>
    %c0_13 = arith.constant 0 : index
    %c0_14 = arith.constant 0 : index
    %19 = vector.load %arg6[%c0_13, %c0_14] : memref<16x128xf32, #tpu.memory_space<vmem>>, vector<16x128xf32>
    tpu.vector_store %arg6[%c0_13, %c0_14], %18 {strides = array<i32>} : memref<16x128xf32, #tpu.memory_space<vmem>>, vector<16x128xf32>,
    return
  }
  func.func @transform_0(%arg0: i32) -> (i32, i32) {
    %c0_i32 = arith.constant 0 : i32
    %c0_i32_0 = arith.constant 0 : i32
    return %arg0, %c0_i32 : i32, i32
  }
  func.func @transform_1(%arg0: i32) -> (i32, i32) {
    %c0_i32 = arith.constant 0 : i32
    %c0_i32_0 = arith.constant 0 : i32
    %c0_i32_1 = arith.constant 0 : i32
    return %c0_i32, %c0_i32_0 : i32, i32
  }
  func.func @transform_2(%arg0: i32) -> (i32, i32) {
    %c0_i32 = arith.constant 0 : i32
    %c0_i32_0 = arith.constant 0 : i32
    %c0_i32_1 = arith.constant 0 : i32
    return %c0_i32, %c0_i32_0 : i32, i32
  }
  func.func @transform_3(%arg0: i32) -> (i32, i32) {
    %c0_i32 = arith.constant 0 : i32
    %c0_i32_0 = arith.constant 0 : i32
    %c0_i32_1 = arith.constant 0 : i32
    return %c0_i32, %c0_i32_0 : i32, i32
  }
  func.func @transform_4(%arg0: i32) -> (i32, i32) {
    %c0_i32 = arith.constant 0 : i32
    %c0_i32_0 = arith.constant 0 : i32
    %c0_i32_1 = arith.constant 0 : i32
    return %c0_i32, %c0_i32_0 : i32, i32
  }
  func.func @transform_5(%arg0: i32) -> (i32, i32) {
    %c0_i32 = arith.constant 0 : i32
    %c0_i32_0 = arith.constant 0 : i32
    return %arg0, %c0_i32 : i32, i32
  }
}

</mosaic_0001>

<bundles_post_ra>
// kernel: tpu_custom_call.1
= control target key start
LH: loop header
LB: loop body
LE: loop exit
PB: predicated region body
PF: predicated region fallthrough
CT: control target
= control target key end

     0   :  { %10 = vsyncpa [#allocation3], 0  ;;  %s614_s0 = inlined_call_operand.hbm [shape: f32[16,32], index: 0, kind: input, shape index: {}]   ;;  %s615_s1 = inlined_call_operand.hbm [shape: f32[32,128], index: 1, kind: input, shape index: {}]   ;;  %s616_s2 = inlined_call_operand.vmem [shape: f32[1,128], index: 2, kind: input, shape index: {}]   ;;  %s617_s3 = inlined_call_operand.hbm [shape: f32[128,128], index: 3, kind: input, shape index: {}]   ;;  %s618_s4 = inlined_call_operand.vmem [shape: f32[1,128], index: 4, kind: input, shape index: {}]   ;;  %s619_s5 = inlined_call_operand.hbm [shape: f32[16,128], index: 5, kind: output, shape index: {}]  }
   0x1   :  { %11 = vsyncpa [#allocation6], 0 }
   0x2   :  { %12 = vsyncpa [#allocation4], 0  ;;  %s503_s18 = smov [#allocation5]   ;;  %s504_s20 = smov [#allocation2]  }
   0x3   :  { %s30_s19 = sshll.u32 %s503_s18, 4  ;;  %s18_s21 = sshll.u32 %s504_s20, 4  ;;  %s31_s19 = int_to_ptr.vmem [resolvable:$true] %s30_s19  ;;  %s539_s21 = int_to_ptr.vmem [resolvable:$true] %s18_s21 }
   0x4   :  { %s409_s24 = scalar_lea.hbm %s615_s1, 512 }
   0x5   :  { %p410_p0 = scmp.ne.s32.totalorder %s615_s1, %s409_s24  ;;  %p413_p1 = scmp.lt.u32.totalorder %s409_s24, %s615_s1 }
   0x7   :  { %p415_p2 = pnand %p413_p1, %p410_p0 }
   0x9   :  { %418 = shalt.err (!%p415_p2)
}
   0xa   :  { %s419_s29 = scalar_lea.vmem %s31_s19, 512  ;;  %p424_p4 = scmp.lt.s32.totalorder %s31_s19, %s31_s19 }
   0xb   :  { %p420_p3 = scmp.ne.s32.totalorder %s31_s19, %s419_s29  ;;  %p425_p5 = scmp.lt.s32.totalorder %s419_s29, %s419_s29 }
   0xd   :  { %p426_p6 = por %p425_p5, %p424_p4 }
   0xf   :  { %p427_p7 = pnand %p426_p6, %p420_p3 }
  0x11   :  { %430 = shalt.err (!%p427_p7)
}
  0x12   :  { %s505_s30 = smov 128   ;;  %s506_s6 = smov 8  }
  0x13   :  { %36 = dma.hbm_to_vmem [thread:$0]  %s615_s1, 512, %s31_s19, [#allocation6], %s505_s30, %s505_s30, %s506_s6  }
  0x14   :  { %s431_s11 = scalar_lea.hbm %s614_s0, 256 }
  0x15   :  { %p432_p8 = scmp.ne.s32.totalorder %s614_s0, %s431_s11  ;;  %p435_p9 = scmp.lt.u32.totalorder %s431_s11, %s614_s0 }
  0x17   :  { %p437_p10 = pnand %p435_p9, %p432_p8 }
  0x19   :  { %440 = shalt.err (!%p437_p10)
}
  0x1a   :  { %s441_s16 = scalar_lea.vmem %s539_s21, 256  ;;  %p446_p12 = scmp.lt.s32.totalorder %s539_s21, %s539_s21 }
  0x1b   :  { %p442_p11 = scmp.ne.s32.totalorder %s539_s21, %s441_s16  ;;  %p447_p13 = scmp.lt.s32.totalorder %s441_s16, %s441_s16 }
  0x1d   :  { %p448_p0 = por %p447_p13, %p446_p12 }
  0x1f   :  { %p449_p1 = pnand %p448_p0, %p442_p11 }
  0x21   :  { %452 = shalt.err (!%p449_p1)
}
  0x22   :  { %24 = dma.hbm_to_vmem [thread:$0]  %s614_s0, 256, %s539_s21, [#allocation3], %s505_s30, %s505_s30, %s506_s6  }
  0x23   :  { %s507_s18 = smov [#allocation7]   ;;  %s453_s23 = scalar_lea.hbm %s617_s3, 2048 }
  0x24   :  { %s44_s19 = sshll.u32 %s507_s18, 4  ;;  %p454_p2 = scmp.ne.s32.totalorder %s617_s3, %s453_s23  ;;  %s45_s19 = int_to_ptr.vmem [resolvable:$true] %s44_s19 }
  0x25   :  { %p457_p3 = scmp.lt.u32.totalorder %s453_s23, %s617_s3 }
  0x27   :  { %p459_p4 = pnand %p457_p3, %p454_p2 }
  0x29   :  { %462 = shalt.err (!%p459_p4)
}
  0x2a   :  { %s463_s28 = scalar_lea.vmem %s45_s19, 2048  ;;  %p468_p6 = scmp.lt.s32.totalorder %s45_s19, %s45_s19 }
  0x2b   :  { %p464_p5 = scmp.ne.s32.totalorder %s45_s19, %s463_s28  ;;  %p469_p7 = scmp.lt.s32.totalorder %s463_s28, %s463_s28 }
  0x2d   :  { %p470_p8 = por %p469_p7, %p468_p6 }
  0x2f   :  { %p471_p9 = pnand %p470_p8, %p464_p5 }
  0x31   :  { %474 = shalt.err (!%p471_p9)
}
  0x32   :  { %50 = dma.hbm_to_vmem [thread:$0]  %s617_s3, 2048, %s45_s19, [#allocation6], %s505_s30, %s505_s30, %s506_s6  }
  0x33   :  { %497 = dma.done.wait [#allocation3], 256  }
  0x34   :  { %498 = vsyncadd [#allocation3], 4294967040 }
  0x35   :  { %499 = dma.done.wait [#allocation6], 2560  }
  0x36   :  { %500 = vsyncadd [#allocation6], 4294964736  ;;  %vm75_vm0 = vcmask 261120   ;;  %v64_v0 = vld [vmem:[#allocation5] sm:$0xff]  ;;  %v65_v1 = vld [vmem:[#allocation5 + $0x8] sm:$0xff]  ;;  %s508_s8 = smov [#allocation8]  }
  0x37   :  { %v66_v2 = vld [vmem:[#allocation5 + $0x10] sm:$0xff]  ;;  %v359_v3 = vpack.c.bf16 %v65_v1, %v64_v0  ;;  %v67_v4 = vld [vmem:[#allocation5 + $0x18] sm:$0xff]  ;;  %v167_v7 = vld [vmem:[#allocation7] sm:$0xff]  ;;  %s272_s9 = sshll.u32 %s508_s8, 4  ;;  %s273_s9 = int_to_ptr.vmem [resolvable:$true] %s272_s9 }
  0x38   :  { %v62_v5 = vld [vmem:[#allocation2] sm:$0xff]  ;;  %v363_v6 = vpack.c.bf16 %v67_v4, %v66_v2  ;;  %v168_v8 = vld [vmem:[#allocation7 + $0x8] sm:$0xff]  ;;  %v170_v11 = vld [vmem:[#allocation7 + $0x18] sm:$0xff]  ;;  %s475_s10 = scalar_lea.vmem %s273_s9, 256  ;;  %p480_p11 = scmp.lt.s32.totalorder %s273_s9, %s273_s9 }
  0x39   :  { %321 = vmatprep.mubr.msk.f32.mxu0 %vm75_vm0, %v62_v5  ;;  %v169_v9 = vld [vmem:[#allocation7 + $0x10] sm:$0xff]  ;;  %360 = vmatprep.subr.bf16.mxu0 %v359_v3  ;;  %v367_v10 = vpack.c.bf16 %v168_v8, %v167_v7  ;;  %v171_v13 = vld [vmem:[#allocation7 + $0x20] sm:$0xff]  ;;  %v172_v14 = vld [vmem:[#allocation7 + $0x28] sm:$0xff]  ;;  %p476_p10 = scmp.ne.s32.totalorder %s273_s9, %s475_s10  ;;  %p481_p12 = scmp.lt.s32.totalorder %s475_s10, %s475_s10 }
  0x3a   :  { %362 = vmatpush3.bf16.msra.mxu0 %v359_v3  ;;  %v371_v12 = vpack.c.bf16 %v170_v11, %v169_v9  ;;  %v375_v15 = vpack.c.bf16 %v172_v14, %v171_v13  ;;  %v63_v16 = vld [vmem:[#allocation2 + $0x8] sm:$0xff]  ;;  %v173_v17 = vld [vmem:[#allocation7 + $0x30] sm:$0xff]  ;;  %v175_v20 = vld [vmem:[#allocation7 + $0x40] sm:$0xff] }
  0x3b   :  { %364 = vmatprep.subr.bf16.mxu0 %v363_v6  ;;  %368 = vmatprep.subr.bf16.mxu1 %v367_v10  ;;  %v174_v18 = vld [vmem:[#allocation7 + $0x38] sm:$0xff]  ;;  %v176_v21 = vld [vmem:[#allocation7 + $0x48] sm:$0xff]  ;;  %v177_v23 = vld [vmem:[#allocation7 + $0x50] sm:$0xff]  ;;  %p482_p13 = por %p481_p12, %p480_p11 }
  0x3c   :  { %370 = vmatpush3.bf16.msra.mxu1 %v367_v10  ;;  %v379_v19 = vpack.c.bf16 %v174_v18, %v173_v17  ;;  %v383_v22 = vpack.c.bf16 %v176_v21, %v175_v20  ;;  %v178_v24 = vld [vmem:[#allocation7 + $0x58] sm:$0xff]  ;;  %v179_v26 = vld [vmem:[#allocation7 + $0x60] sm:$0xff]  ;;  %v180_v27 = vld [vmem:[#allocation7 + $0x68] sm:$0xff] }
  0x3d   :  { %372 = vmatprep.subr.bf16.mxu1 %v371_v12  ;;  %v387_v25 = vpack.c.bf16 %v178_v24, %v177_v23  ;;  %v391_v28 = vpack.c.bf16 %v180_v27, %v179_v26  ;;  %v181_v29 = vld [vmem:[#allocation7 + $0x70] sm:$0xff]  ;;  %v182_v30 = vld [vmem:[#allocation7 + $0x78] sm:$0xff]  ;;  %p483_p0 = pnand %p482_p13, %p476_p10 }
  0x3e   :  { %366 = vmatpush3.bf16.msra.mxu0 %v363_v6  ;;  %v395_v31 = vpack.c.bf16 %v182_v30, %v181_v29  ;;  %v285_v32 = vld [vmem:[%s616_s2] ss:$0 sm:$0xff] }
  0x3f   :  { %v288_v47 = vld [vmem:[%s618_s4] ss:$0 sm:$0xff] }
  0x40   :  { %374 = vmatpush3.bf16.msra.mxu1 %v371_v12 }
  0x41   :  { %322 = vmatmul.mubr.msk.f32.vlgmr.msra.gmra.mrb[0].mxu0 %vm75_vm0, %v63_v16  ;;  %376 = vmatprep.subr.bf16.mxu1 %v375_v15 }
  0x44   :  { %378 = vmatpush3.bf16.msra.mxu1 %v375_v15 }
  0x45   :  { %380 = vmatprep.subr.bf16.mxu1 %v379_v19 }
  0x48   :  { %382 = vmatpush3.bf16.msra.mxu1 %v379_v19 }
  0x49   :  { %384 = vmatprep.subr.bf16.mxu1 %v383_v22 }
  0x4c   :  { %386 = vmatpush3.bf16.msra.mxu1 %v383_v22 }
  0x4d   :  { %388 = vmatprep.subr.bf16.mxu1 %v387_v25 }
  0x50   :  { %390 = vmatpush3.bf16.msra.mxu1 %v387_v25 }
  0x51   :  { %392 = vmatprep.subr.bf16.mxu1 %v391_v28 }
  0x54   :  { %394 = vmatpush3.bf16.msra.mxu1 %v391_v28 }
  0x55   :  { %396 = vmatprep.subr.bf16.mxu1 %v395_v31 }
  0x58   :  { %398 = vmatpush3.bf16.msra.mxu1 %v395_v31 }
 0x114   :  { %v323_v33 = vpop.f32.mrb[0].mxu0 }
 0x115   :  { %v154_v34 = vadd.f32 %v323_v33, %v285_v32  ;;  %v148_v35 = vpop.f32.mrb[1].mxu0 }
 0x116   :  { %v149_v36 = vadd.f32 %v285_v32, %v148_v35 }
 0x117   :  { %v160_v37 = vmul.f32 0.70710677, %v154_v34  ;;  %v158_v44 = vmul.f32 0.5, %v154_v34 }
 0x118   :  { %v159_v38 = vmul.f32 0.70710677, %v149_v36  ;;  %v157_v42 = vmul.f32 0.5, %v149_v36 }
 0x119   :  { %405 = verf.f32 %v160_v37 }
 0x11a   :  { %407 = verf.f32 %v159_v38 }
 0x123   :  { %v406_v39 = vpop.eup %405 }
 0x124   :  { %v408_v40 = vpop.eup %407  ;;  %v164_v41 = vadd.f32 1.0, %v406_v39 }
 0x125   :  { %v163_v43 = vadd.f32 1.0, %v408_v40 }
 0x126   :  { %v166_v46 = vmul.f32 %v164_v41, %v158_v44 }
 0x127   :  { %v165_v45 = vmul.f32 %v163_v43, %v157_v42 }
 0x129   :  { %356 = vmatprep.mubr.f32.mxu1 %v165_v45 }
 0x12a   :  { %357 = vmatmul.mubr.f32.vlgmr.msra.gmra.mrb[0].mxu1 %v166_v46 }
 0x1fd   :  { %v358_v48 = vpop.f32.mrb[0].mxu1 }
 0x1fe   :  { %v262_v49 = vadd.f32 %v358_v48, %v288_v47  ;;  %v256_v50 = vpop.f32.mrb[1].mxu1 }
 0x1ff   :  { %v257_v51 = vadd.f32 %v288_v47, %v256_v50 }
 0x200   :  { %266 = vst [vmem:[#allocation8 + $0x8] sm:$0xff] %v262_v49 }
 0x201   :  { %265 = vst [vmem:[#allocation8] sm:$0xff] %v257_v51 }
 0x202   :  { %486 = shalt.err (!%p483_p0)
}
 0x203   :  { %s487_s4 = scalar_lea.hbm %s619_s5, 256 }
 0x204   :  { %p488_p1 = scmp.ne.s32.totalorder %s619_s5, %s487_s4  ;;  %p491_p2 = scmp.lt.u32.totalorder %s487_s4, %s619_s5 }
 0x206   :  { %p493_p3 = pnand %p491_p2, %p488_p1 }
 0x208   :  { %496 = shalt.err (!%p493_p3)
}
 0x209   :  { %278 = dma.vmem_to_hbm [thread:$0]  %s273_s9, 256, %s619_s5, [#allocation4], %s505_s30, %s505_s30, %s506_s6  }
 0x20a   :  { %501 = dma.done.wait [#allocation4], 256  }
 0x20b   :  { %502 = vsyncadd [#allocation4], 4294967040 }
 0x20c   :  { %282 = vsyncpa [#allocation3], 1 }
 0x20d   :  { %283 = vsyncpa [#allocation6], 1 }
 0x20e   :  { %284 = vsyncpa [#allocation4], 1 }

// kernel: tpu_custom_call.1
= control target key start
LH: loop header
LB: loop body
LE: loop exit
PB: predicated region body
PF: predicated region fallthrough
CT: control target
= control target key end

     0   :  { %10 = vsyncpa [#allocation3], 0  ;;  %s614_s0 = inlined_call_operand.hbm [shape: f32[16,32], index: 0, kind: input, shape index: {}]   ;;  %s615_s1 = inlined_call_operand.hbm [shape: f32[32,128], index: 1, kind: input, shape index: {}]   ;;  %s616_s2 = inlined_call_operand.vmem [shape: f32[1,128], index: 2, kind: input, shape index: {}]   ;;  %s617_s3 = inlined_call_operand.hbm [shape: f32[128,128], index: 3, kind: input, shape index: {}]   ;;  %s618_s4 = inlined_call_operand.vmem [shape: f32[1,128], index: 4, kind: input, shape index: {}]   ;;  %s619_s5 = inlined_call_operand.hbm [shape: f32[16,128], index: 5, kind: output, shape index: {}]  }
   0x1   :  { %11 = vsyncpa [#allocation6], 0 }
   0x2   :  { %12 = vsyncpa [#allocation4], 0  ;;  %s503_s18 = smov [#allocation5]   ;;  %s504_s20 = smov [#allocation2]  }
   0x3   :  { %s30_s19 = sshll.u32 %s503_s18, 4  ;;  %s18_s21 = sshll.u32 %s504_s20, 4  ;;  %s31_s19 = int_to_ptr.vmem [resolvable:$true] %s30_s19  ;;  %s539_s21 = int_to_ptr.vmem [resolvable:$true] %s18_s21 }
   0x4   :  { %s409_s24 = scalar_lea.hbm %s615_s1, 512 }
   0x5   :  { %p410_p0 = scmp.ne.s32.totalorder %s615_s1, %s409_s24  ;;  %p413_p1 = scmp.lt.u32.totalorder %s409_s24, %s615_s1 }
   0x7   :  { %p415_p2 = pnand %p413_p1, %p410_p0 }
   0x9   :  { %418 = shalt.err (!%p415_p2)
}
   0xa   :  { %s419_s29 = scalar_lea.vmem %s31_s19, 512  ;;  %p424_p4 = scmp.lt.s32.totalorder %s31_s19, %s31_s19 }
   0xb   :  { %p420_p3 = scmp.ne.s32.totalorder %s31_s19, %s419_s29  ;;  %p425_p5 = scmp.lt.s32.totalorder %s419_s29, %s419_s29 }
   0xd   :  { %p426_p6 = por %p425_p5, %p424_p4 }
   0xf   :  { %p427_p7 = pnand %p426_p6, %p420_p3 }
  0x11   :  { %430 = shalt.err (!%p427_p7)
}
  0x12   :  { %s505_s30 = smov 128   ;;  %s506_s6 = smov 8  }
  0x13   :  { %36 = dma.hbm_to_vmem [thread:$0]  %s615_s1, 512, %s31_s19, [#allocation6], %s505_s30, %s505_s30, %s506_s6  }
  0x14   :  { %s431_s11 = scalar_lea.hbm %s614_s0, 256 }
  0x15   :  { %p432_p8 = scmp.ne.s32.totalorder %s614_s0, %s431_s11  ;;  %p435_p9 = scmp.lt.u32.totalorder %s431_s11, %s614_s0 }
  0x17   :  { %p437_p10 = pnand %p435_p9, %p432_p8 }
  0x19   :  { %440 = shalt.err (!%p437_p10)
}
  0x1a   :  { %s441_s16 = scalar_lea.vmem %s539_s21, 256  ;;  %p446_p12 = scmp.lt.s32.totalorder %s539_s21, %s539_s21 }
  0x1b   :  { %p442_p11 = scmp.ne.s32.totalorder %s539_s21, %s441_s16  ;;  %p447_p13 = scmp.lt.s32.totalorder %s441_s16, %s441_s16 }
  0x1d   :  { %p448_p0 = por %p447_p13, %p446_p12 }
  0x1f   :  { %p449_p1 = pnand %p448_p0, %p442_p11 }
  0x21   :  { %452 = shalt.err (!%p449_p1)
}
  0x22   :  { %24 = dma.hbm_to_vmem [thread:$0]  %s614_s0, 256, %s539_s21, [#allocation3], %s505_s30, %s505_s30, %s506_s6  }
  0x23   :  { %s507_s18 = smov [#allocation7]   ;;  %s453_s23 = scalar_lea.hbm %s617_s3, 2048 }
  0x24   :  { %s44_s19 = sshll.u32 %s507_s18, 4  ;;  %p454_p2 = scmp.ne.s32.totalorder %s617_s3, %s453_s23  ;;  %s45_s19 = int_to_ptr.vmem [resolvable:$true] %s44_s19 }
  0x25   :  { %p457_p3 = scmp.lt.u32.totalorder %s453_s23, %s617_s3 }
  0x27   :  { %p459_p4 = pnand %p457_p3, %p454_p2 }
  0x29   :  { %462 = shalt.err (!%p459_p4)
}
  0x2a   :  { %s463_s28 = scalar_lea.vmem %s45_s19, 2048  ;;  %p468_p6 = scmp.lt.s32.totalorder %s45_s19, %s45_s19 }
  0x2b   :  { %p464_p5 = scmp.ne.s32.totalorder %s45_s19, %s463_s28  ;;  %p469_p7 = scmp.lt.s32.totalorder %s463_s28, %s463_s28 }
  0x2d   :  { %p470_p8 = por %p469_p7, %p468_p6 }
  0x2f   :  { %p471_p9 = pnand %p470_p8, %p464_p5 }
  0x31   :  { %474 = shalt.err (!%p471_p9)
}
  0x32   :  { %50 = dma.hbm_to_vmem [thread:$0]  %s617_s3, 2048, %s45_s19, [#allocation6], %s505_s30, %s505_s30, %s506_s6  }
  0x33   :  { %497 = dma.done.wait [#allocation3], 256  }
  0x34   :  { %498 = vsyncadd [#allocation3], 4294967040 }
  0x35   :  { %499 = dma.done.wait [#allocation6], 2560  }
  0x36   :  { %500 = vsyncadd [#allocation6], 4294964736  ;;  %vm75_vm0 = vcmask 261120   ;;  %v64_v0 = vld [vmem:[#allocation5] sm:$0xff]  ;;  %v65_v1 = vld [vmem:[#allocation5 + $0x8] sm:$0xff]  ;;  %s508_s8 = smov [#allocation8]  }
  0x37   :  { %v66_v2 = vld [vmem:[#allocation5 + $0x10] sm:$0xff]  ;;  %v359_v3 = vpack.c.bf16 %v65_v1, %v64_v0  ;;  %v67_v4 = vld [vmem:[#allocation5 + $0x18] sm:$0xff]  ;;  %v167_v7 = vld [vmem:[#allocation7] sm:$0xff]  ;;  %s272_s9 = sshll.u32 %s508_s8, 4  ;;  %s273_s9 = int_to_ptr.vmem [resolvable:$true] %s272_s9 }
  0x38   :  { %v62_v5 = vld [vmem:[#allocation2] sm:$0xff]  ;;  %v363_v6 = vpack.c.bf16 %v67_v4, %v66_v2  ;;  %v168_v8 = vld [vmem:[#allocation7 + $0x8] sm:$0xff]  ;;  %v170_v11 = vld [vmem:[#allocation7 + $0x18] sm:$0xff]  ;;  %s475_s10 = scalar_lea.vmem %s273_s9, 256  ;;  %p480_p11 = scmp.lt.s32.totalorder %s273_s9, %s273_s9 }
  0x39   :  { %321 = vmatprep.mubr.msk.f32.mxu0 %vm75_vm0, %v62_v5  ;;  %v169_v9 = vld [vmem:[#allocation7 + $0x10] sm:$0xff]  ;;  %360 = vmatprep.subr.bf16.mxu0 %v359_v3  ;;  %v367_v10 = vpack.c.bf16 %v168_v8, %v167_v7  ;;  %v171_v13 = vld [vmem:[#allocation7 + $0x20] sm:$0xff]  ;;  %v172_v14 = vld [vmem:[#allocation7 + $0x28] sm:$0xff]  ;;  %p476_p10 = scmp.ne.s32.totalorder %s273_s9, %s475_s10  ;;  %p481_p12 = scmp.lt.s32.totalorder %s475_s10, %s475_s10 }
  0x3a   :  { %362 = vmatpush3.bf16.msra.mxu0 %v359_v3  ;;  %v371_v12 = vpack.c.bf16 %v170_v11, %v169_v9  ;;  %v375_v15 = vpack.c.bf16 %v172_v14, %v171_v13  ;;  %v63_v16 = vld [vmem:[#allocation2 + $0x8] sm:$0xff]  ;;  %v173_v17 = vld [vmem:[#allocation7 + $0x30] sm:$0xff]  ;;  %v175_v20 = vld [vmem:[#allocation7 + $0x40] sm:$0xff] }
  0x3b   :  { %364 = vmatprep.subr.bf16.mxu0 %v363_v6  ;;  %368 = vmatprep.subr.bf16.mxu1 %v367_v10  ;;  %v174_v18 = vld [vmem:[#allocation7 + $0x38] sm:$0xff]  ;;  %v176_v21 = vld [vmem:[#allocation7 + $0x48] sm:$0xff]  ;;  %v177_v23 = vld [vmem:[#allocation7 + $0x50] sm:$0xff]  ;;  %p482_p13 = por %p481_p12, %p480_p11 }
  0x3c   :  { %370 = vmatpush3.bf16.msra.mxu1 %v367_v10  ;;  %v379_v19 = vpack.c.bf16 %v174_v18, %v173_v17  ;;  %v383_v22 = vpack.c.bf16 %v176_v21, %v175_v20  ;;  %v178_v24 = vld [vmem:[#allocation7 + $0x58] sm:$0xff]  ;;  %v179_v26 = vld [vmem:[#allocation7 + $0x60] sm:$0xff]  ;;  %v180_v27 = vld [vmem:[#allocation7 + $0x68] sm:$0xff] }
  0x3d   :  { %372 = vmatprep.subr.bf16.mxu1 %v371_v12  ;;  %v387_v25 = vpack.c.bf16 %v178_v24, %v177_v23  ;;  %v391_v28 = vpack.c.bf16 %v180_v27, %v179_v26  ;;  %v181_v29 = vld [vmem:[#allocation7 + $0x70] sm:$0xff]  ;;  %v182_v30 = vld [vmem:[#allocation7 + $0x78] sm:$0xff]  ;;  %p483_p0 = pnand %p482_p13, %p476_p10 }
  0x3e   :  { %366 = vmatpush3.bf16.msra.mxu0 %v363_v6  ;;  %v395_v31 = vpack.c.bf16 %v182_v30, %v181_v29  ;;  %v285_v32 = vld [vmem:[%s616_s2] ss:$0 sm:$0xff] }
  0x3f   :  { %v288_v47 = vld [vmem:[%s618_s4] ss:$0 sm:$0xff] }
  0x40   :  { %374 = vmatpush3.bf16.msra.mxu1 %v371_v12 }
  0x41   :  { %322 = vmatmul.mubr.msk.f32.vlgmr.msra.gmra.mrb[0].mxu0 %vm75_vm0, %v63_v16  ;;  %376 = vmatprep.subr.bf16.mxu1 %v375_v15 }
  0x44   :  { %378 = vmatpush3.bf16.msra.mxu1 %v375_v15 }
  0x45   :  { %380 = vmatprep.subr.bf16.mxu1 %v379_v19 }
  0x48   :  { %382 = vmatpush3.bf16.msra.mxu1 %v379_v19 }
  0x49   :  { %384 = vmatprep.subr.bf16.mxu1 %v383_v22 }
  0x4c   :  { %386 = vmatpush3.bf16.msra.mxu1 %v383_v22 }
  0x4d   :  { %388 = vmatprep.subr.bf16.mxu1 %v387_v25 }
  0x50   :  { %390 = vmatpush3.bf16.msra.mxu1 %v387_v25 }
  0x51   :  { %392 = vmatprep.subr.bf16.mxu1 %v391_v28 }
  0x54   :  { %394 = vmatpush3.bf16.msra.mxu1 %v391_v28 }
  0x55   :  { %396 = vmatprep.subr.bf16.mxu1 %v395_v31 }
  0x58   :  { %398 = vmatpush3.bf16.msra.mxu1 %v395_v31 }
 0x114   :  { %v323_v33 = vpop.f32.mrb[0].mxu0 }
 0x115   :  { %v154_v34 = vadd.f32 %v323_v33, %v285_v32  ;;  %v148_v35 = vpop.f32.mrb[1].mxu0 }
 0x116   :  { %v149_v36 = vadd.f32 %v285_v32, %v148_v35 }
 0x117   :  { %v160_v37 = vmul.f32 0.70710677, %v154_v34  ;;  %v158_v44 = vmul.f32 0.5, %v154_v34 }
 0x118   :  { %v159_v38 = vmul.f32 0.70710677, %v149_v36  ;;  %v157_v42 = vmul.f32 0.5, %v149_v36 }
 0x119   :  { %405 = verf.f32 %v160_v37 }
 0x11a   :  { %407 = verf.f32 %v159_v38 }
 0x123   :  { %v406_v39 = vpop.eup %405 }
 0x124   :  { %v408_v40 = vpop.eup %407  ;;  %v164_v41 = vadd.f32 1.0, %v406_v39 }
 0x125   :  { %v163_v43 = vadd.f32 1.0, %v408_v40 }
 0x126   :  { %v166_v46 = vmul.f32 %v164_v41, %v158_v44 }
 0x127   :  { %v165_v45 = vmul.f32 %v163_v43, %v157_v42 }
 0x129   :  { %356 = vmatprep.mubr.f32.mxu1 %v165_v45 }
 0x12a   :  { %357 = vmatmul.mubr.f32.vlgmr.msra.gmra.mrb[0].mxu1 %v166_v46 }
 0x1fd   :  { %v358_v48 = vpop.f32.mrb[0].mxu1 }
 0x1fe   :  { %v262_v49 = vadd.f32 %v358_v48, %v288_v47  ;;  %v256_v50 = vpop.f32.mrb[1].mxu1 }
 0x1ff   :  { %v257_v51 = vadd.f32 %v288_v47, %v256_v50 }
 0x200   :  { %266 = vst [vmem:[#allocation8 + $0x8] sm:$0xff] %v262_v49 }
 0x201   :  { %265 = vst [vmem:[#allocation8] sm:$0xff] %v257_v51 }
 0x202   :  { %486 = shalt.err (!%p483_p0)
}
 0x203   :  { %s487_s4 = scalar_lea.hbm %s619_s5, 256 }
 0x204   :  { %p488_p1 = scmp.ne.s32.totalorder %s619_s5, %s487_s4  ;;  %p491_p2 = scmp.lt.u32.totalorder %s487_s4, %s619_s5 }
 0x206   :  { %p493_p3 = pnand %p491_p2, %p488_p1 }
 0x208   :  { %496 = shalt.err (!%p493_p3)
}
 0x209   :  { %278 = dma.vmem_to_hbm [thread:$0]  %s273_s9, 256, %s619_s5, [#allocation4], %s505_s30, %s505_s30, %s506_s6  }
 0x20a   :  { %501 = dma.done.wait [#allocation4], 256  }
 0x20b   :  { %502 = vsyncadd [#allocation4], 4294967040 }
 0x20c   :  { %282 = vsyncpa [#allocation3], 1 }
 0x20d   :  { %283 = vsyncpa [#allocation6], 1 }
 0x20e   :  { %284 = vsyncpa [#allocation4], 1 }

</bundles_post_ra>
